<compile_context>
chip_gen: v6e
topology: v6e:2x2x1
jax: 0.10.0
libtpu: 0.0.40
codegen_flags: <defaults>
</compile_context>

<pallas_src>
import jax
import jax.numpy as jnp
from jax.experimental import pallas as pl
from jax.experimental.pallas import tpu as pltpu

K_IN = 784    # flattened 28x28 MNIST
N_OUT = 10
N_PAD = 128   # lane-dense output width (caller slices [:, :10])


def _round_up(x, m):
    return ((x + m - 1) // m) * m


def mlp_kernel(x_ref, w_ref, b_ref, o_ref):
    # Fused folded linear layer for one batch tile:
    #   (tb, 784) f32 @ (784, 128) f32 -> f32 MXU accumulate, + broadcast bias.
    o_ref[...] = (
        jnp.dot(x_ref[...], w_ref[...], preferred_element_type=jnp.float32)
        + b_ref[...]
    )


def prepare_params(w1, b1, w2, b2):
    """Fold + pad the two Linear layers ONCE, off the per-call hot path.

    Valid because Dropout(p=0) is identity and there is no activation between
    the layers:  (x @ W1 + b1) @ W2 + b2 == x @ (W1 @ W2) + (b1 @ W2 + b2).
    """
    w_fold = w1 @ w2                       # (784, 10) f32
    b_fold = b1 @ w2 + b2                  # (10,)     f32
    w_pad = jnp.zeros((K_IN, N_PAD), jnp.float32).at[:, :N_OUT].set(w_fold)
    b_pad = jnp.zeros((1, N_PAD), jnp.float32).at[:, :N_OUT].set(b_fold)
    return w_pad, b_pad


def mlp_forward(x, w_pad, b_pad, *, tb=1024):
    """Forward pass of the torch Model (dropout p=0).

    x:     (B, 784) float32
    w_pad: (784, 128) float32, b_pad: (1, 128) float32  (from prepare_params)
    Returns (B, 10) float32 logits.
    """
    B = x.shape[0]

    # Tile selection: multiple of 16, and keep >= 2 batch tiles so the
    # "parallel" grid axis can shard across v7x's two TensorCores.
    tb_eff = min(tb, max(16, _round_up(-(-B // 2), 16)))
    grid = (pl.cdiv(B, tb_eff),)

    cost = pl.CostEstimate(
        flops=2 * B * K_IN * N_PAD,
        transcendentals=0,
        bytes_accessed=(B * K_IN + K_IN * N_PAD + N_PAD + B * N_PAD) * 4,
    )

    out = pl.pallas_call(
        mlp_kernel,
        out_shape=jax.ShapeDtypeStruct((B, N_PAD), jnp.float32),
        grid_spec=pltpu.PrefetchScalarGridSpec(
            num_scalar_prefetch=0,
            grid=grid,
            in_specs=[
                # x tile: last dim 784 equals the full array dim (legal; Mosaic
                # pads lanes in VMEM) -- x is read from HBM exactly once.
                pl.BlockSpec((tb_eff, K_IN), lambda i: (i, 0)),
                pl.BlockSpec((K_IN, N_PAD), lambda i: (0, 0)),   # folded weight (resident)
                pl.BlockSpec((1, N_PAD), lambda i: (0, 0)),      # folded bias (resident)
            ],
            out_specs=pl.BlockSpec((tb_eff, N_PAD), lambda i: (i, 0)),
        ),
        compiler_params=pltpu.CompilerParams(
            dimension_semantics=("parallel",)),   # shard batch tiles across TCs
        cost_estimate=cost,
    )(x, w_pad, b_pad)

    return out[:, :N_OUT]


def init_params(key):
    # Deterministic init matching torch.nn.Linear's uniform(-1/sqrt(fan_in), ...)
    k1, k2, k3, k4 = jax.random.split(key, 4)
    lim1 = 1.0 / jnp.sqrt(784.0)
    lim2 = 1.0 / jnp.sqrt(16.0)
    w1 = jax.random.uniform(k1, (784, 16), jnp.float32, -lim1, lim1)
    b1 = jax.random.uniform(k2, (16,), jnp.float32, -lim1, lim1)
    w2 = jax.random.uniform(k3, (16, 10), jnp.float32, -lim2, lim2)
    b2 = jax.random.uniform(k4, (10,), jnp.float32, -lim2, lim2)
    return w1, b1, w2, b2


if __name__ == "__main__":
    key = jax.random.PRNGKey(0)
    kx, kp = jax.random.split(key)
    batch = 100  # torch module's training batch size; exercises the ragged last tile
    x = jax.random.uniform(kx, (batch, 784), jnp.float32)  # like MNIST /255 pixels
    w1, b1, w2, b2 = init_params(kp)

    # Fold/pad weights once (off the hot path), then run the kernel.
    w_pad, b_pad = prepare_params(w1, b1, w2, b2)
    out = mlp_forward(x, w_pad, b_pad)
    out = jax.block_until_ready(out)
    assert out.shape == (batch, 10)

    # Reference: exact f32 torch-semantics forward (dropout p=0 == identity).
    ref = (x @ w1 + b1) @ w2 + b2
    assert jnp.allclose(out, ref, atol=1e-3, rtol=1e-3), float(
        jnp.max(jnp.abs(out - ref)))

    print("KERNEL_OK")
</pallas_src>

<mosaic_0001>
module attributes {stable_mosaic.version = 11 : i64} {
  func.func @mlp_kernel(%arg0: i32, %arg1: memref<64x784xf32, #tpu.memory_space<vmem>>, %arg2: memref<784x128xf32, #tpu.memory_space<vmem>>, %arg3: memref<1x128xf32, #tpu.memory_space<vmem>>, %arg4: memref<64x128xf32, #tpu.memory_space<vmem>>) attributes {dimension_semantics = [#tpu.dimension_semantics<parallel>], iteration_bounds = array<i64: 2>, scalar_prefetch = 0 : i64, scratch_operands = 0 : i64, tpu.core_type = #tpu.core_type<tc>, window_params = [{transform_indices = @transform_0, window_bounds = array<i64: 64, 784>}, {pipeline_mode = #tpu.pipeline_mode<synchronous>, transform_indices = @transform_1, window_bounds = array<i64: 784, 128>}, {pipeline_mode = #tpu.pipeline_mode<synchronous>, transform_indices = @transform_2, window_bounds = array<i64: 1, 128>}, {transform_indices = @transform_3, window_bounds = array<i64: 64, 128>}]} {
    %c0 = arith.constant 0 : index
    %c0_0 = arith.constant 0 : index
    %0 = vector.load %arg1[%c0, %c0_0] : memref<64x784xf32, #tpu.memory_space<vmem>>, vector<64x784xf32>
    %c0_1 = arith.constant 0 : index
    %c0_2 = arith.constant 0 : index
    %1 = vector.load %arg2[%c0_1, %c0_2] : memref<784x128xf32, #tpu.memory_space<vmem>>, vector<784x128xf32>
    %cst = arith.constant dense<0.000000e+00> : vector<64x128xf32>
    %2 = tpu.matmul %0, %1, %cst {dimension_numbers = #tpu.dot_dimension_numbers<[1], [0], [0], [1], [0, 0, 1, 1], [], []>} : vector<64x784xf32>, vector<784x128xf32>, vector<64x128xf32> -> vector<64x128xf32>
    %c0_3 = arith.constant 0 : index
    %c0_4 = arith.constant 0 : index
    %3 = vector.load %arg3[%c0_3, %c0_4] : memref<1x128xf32, #tpu.memory_space<vmem>>, vector<1x128xf32>
    %4 = vector.broadcast %3 : vector<1x128xf32> to vector<64x128xf32>
    %5 = arith.addf %2, %4 : vector<64x128xf32>
    %c0_5 = arith.constant 0 : index
    %c0_6 = arith.constant 0 : index
    %6 = vector.load %arg4[%c0_5, %c0_6] : memref<64x128xf32, #tpu.memory_space<vmem>>, vector<64x128xf32>
    tpu.vector_store %arg4[%c0_5, %c0_6], %5 {strides = array<i32>} : memref<64x128xf32, #tpu.memory_space<vmem>>, vector<64x128xf32>,
    return
  }
  func.func @transform_0(%arg0: i32) -> (i32, i32) {
    %c0_i32 = arith.constant 0 : i32
    %c0_i32_0 = arith.constant 0 : i32
    return %arg0, %c0_i32 : i32, i32
  }
  func.func @transform_1(%arg0: i32) -> (i32, i32) {
    %c0_i32 = arith.constant 0 : i32
    %c0_i32_0 = arith.constant 0 : i32
    %c0_i32_1 = arith.constant 0 : i32
    return %c0_i32, %c0_i32_0 : i32, i32
  }
  func.func @transform_2(%arg0: i32) -> (i32, i32) {
    %c0_i32 = arith.constant 0 : i32
    %c0_i32_0 = arith.constant 0 : i32
    %c0_i32_1 = arith.constant 0 : i32
    return %c0_i32, %c0_i32_0 : i32, i32
  }
  func.func @transform_3(%arg0: i32) -> (i32, i32) {
    %c0_i32 = arith.constant 0 : i32
    %c0_i32_0 = arith.constant 0 : i32
    return %arg0, %c0_i32 : i32, i32
  }
}

</mosaic_0001>

<bundles_post_ra>
// kernel: tpu_custom_call.1
= control target key start
LH: loop header
LB: loop body
LE: loop exit
PB: predicated region body
PF: predicated region fallthrough
CT: control target
= control target key end

     0   :  { %8 = vsyncpa [#allocation3], 0  ;;  %s1702_s0 = inlined_call_operand.hbm [shape: f32[100,784], index: 0, kind: input, shape index: {}]   ;;  %s1703_s1 = inlined_call_operand.hbm [shape: f32[784,128], index: 1, kind: input, shape index: {}]   ;;  %s1704_s2 = inlined_call_operand.vmem [shape: f32[1,128], index: 2, kind: input, shape index: {}]   ;;  %s1705_s3 = inlined_call_operand.hbm [shape: f32[100,128], index: 3, kind: output, shape index: {}]  }
   0x1   :  { %10 = vsyncpa [#allocation3 + $0x1], 0 }
   0x2   :  { %11 = vsyncpa [#allocation6], 0 }
   0x3   :  { %12 = vsyncpa [#allocation4], 0 }
   0x4   :  { %14 = vsyncpa [#allocation4 + $0x1], 0  ;;  %s1409_s12 = smov 0   ;;  %s1411_s13 = smov 0  }
   0x5   :  { %s1413_s14 = smov 0   ;;  %s1415_s15 = smov 0  }
   0x6 LB: > { %s1430_s16 = sadd.s32 4294967295, %s1378_s15   ;;  %s940_s17 = sadd.s32 4294967294, %s1378_s15   ;;  %s1378_s15 = sphi %s1415_s15, %s1720_s15   ;;  %s1374_s14 = sphi %s1413_s14, %s1719_s14   ;;  %s1370_s13 = sphi %s1411_s13, %s1718_s13   ;;  %s1366_s12 = sphi %s1409_s12, %s1717_s12  }
   0x7   : > { %s1434_s18 = sadd.s32 1, %s1378_s15   ;;  %s27_s19 = sadd.s32 1, %s1374_s14 }
   0x8   : > { %s24_s20 = ssub.s32 %s1378_s15, %s1434_s18  ;;  %p34_p0 = scmp.ne.s32.totalorder %s1374_s14, %s1370_s13 }
   0x9   : > { %p25_p1 = scmp.eq.s32.totalorder %s24_s20, 0  ;;  %p35_p2 = scmp.eq.s32.totalorder %s1378_s15, 0 }
   0xa   : > { %p40_p3 = scmp.ne.s32.totalorder %s1370_s13, %s1366_s12  ;;  %p41_p4 = scmp.eq.s32.totalorder %s1430_s16, 0 }
   0xb   : > { %s1446_s21 = scalar_select %p25_p1, %s1374_s14, %s27_s19  }
   0xc   : > { %p1448_p5 = por %p35_p2, %p34_p0  ;;  %p1454_p6 = por %p41_p4, %p40_p3 }
   0xd   : > { %p106_p7 = scmp.eq.s32.totalorder %s1430_s16, 1  ;;  %p112_p8 = scmp.eq.s32.totalorder %s940_s17, 1 }
   0xe   : > { %s1709_s23 = scalar_select %p1454_p6, 1, 0 }
   0xf   : > { %p941_p9 = scmp.ge.s32.totalorder %s1378_s15, 1  ;;  %p119_p10 = scmp.lt.s32.totalorder %s1378_s15, 3 }
  0x10   : > { %p1461_p11 = por %p106_p7, %p34_p0  ;;  %p1465_p12 = por %p112_p8, %p40_p3 }
  0x11   : > { %p1469_p13 = pnand %p941_p9, %p119_p10  ;;  %s1380_s27 = smov [#allocation5]  }
  0x12   : > { %s1710_s24 = scalar_select %p1461_p11, 1, 0 }
  0x13   : > { %s1711_s25 = scalar_select %p1465_p12, 1, 0 }
  0x14   : > { %p1208_p1 = pneg %p1469_p13  ;;  %s131_s28 = sshll.u32 %s1380_s27, 4  ;;  %s132_s28 = int_to_ptr.vmem [resolvable:$true] %s131_s28 }
  0x15   : > { %s1269_s29 = scalar_lea.vmem %s132_s28, 12544  ;;  %p1277_p8 = scmp.lt.s32.totalorder %s132_s28, %s132_s28 }
  0x16   : > { %p1209_p2 = pnand %p1208_p1, %p41_p4  ;;  %p1270_p7 = scmp.ne.s32.totalorder %s132_s28, %s1269_s29 }
  0x17   : > { %p1278_p6 = scmp.lt.s32.totalorder %s1269_s29, %s1269_s29 }
  0x18   : > { %p1260_p0 = pneg %p1209_p2 }
  0x19   : > { %p1279_p12 = por %p1278_p6, %p1277_p8 }
  0x1a   : > { %p1272_p11 = pnand %p1270_p7, %p1260_p0 }
  0x1c   : > { %p1273_p3 = pneg %p1272_p11 }
  0x1e   : > { %p1280_p9 = pnand %p1279_p12, %p1273_p3 }
  0x20   : > { %1283 = shalt.err (!%p1280_p9)
}
  0x21   : > { %s1381_s30 = smov 128   ;;  %s1382_s4 = smov 8  }
  0x22   : > { %1211 = dma.hbm_to_vmem [thread:$0]  (!%p1209_p2), %s1703_s1, 12544, %s132_s28, [#allocation6], %s1381_s30, %s1381_s30, %s1382_s4  }
  0x23   : > { %p1707_p10 = scmp.ge.s32.totalorder %s1378_s15, 2 }
  0x25   : > { %144 = sbr.rel (%p1707_p10) target bundleno = 76 (0x4c), region = 24 }
  0x2a   : > { %147 = sbr.rel (!%p1448_p5) target bundleno = 76 (0x4c), region = 28  ;;  %s148_s7 = sand.u32 (%p1448_p5), 1, %s1374_s14  }
  0x2b   : > { %s944_s8 = sshll.u32 (%p1448_p5), %s1378_s15, 3  ;;  %s1199_s9 = smul.u32 (%p1448_p5), 448, %s148_s7 }
  0x2c   : > { %s154_s10 = ssub.s32 (%p1448_p5), 13, %s944_s8  ;;  %s1490_s19 = scalar_lea.sflag (%p1448_p5), [#allocation3], %s148_s7 }
  0x2d   : > { %p155_p6 = scmp.lt.s32.totalorder (%p1448_p5), %s154_s10, 8  ;;  %s152_s20 = scalar_lea.vmem (%p1448_p5), [#allocation2], %s1199_s9 }
  0x2f   : > { %s1722_s10 = smov (!%p155_p6, %s154_s10), 8 }
  0x30   : > { %s1487_s11 = smul.u32 896, %s1722_s10 }
  0x32   : > { %s160_s17 = ssub.s32 7168, %s1487_s11 }
  0x33   : > { %161 = vsyncadd %s1490_s19, %s160_s17  ;;  %p947_p5 = scmp.ne.s32.totalorder %s1487_s11, 0  ;;  %s1200_s22 = smul.u32 7168, %s1378_s15 }
  0x34   : > { %s167_s27 = sshll.u32 %s152_s20, 4  ;;  %s1288_s7 = scalar_lea.hbm %s1702_s0, 11648  ;;  %s1500_s27 = int_to_ptr.vmem [resolvable:$true] %s167_s27 }
  0x35   : > { %s1498_s30 = scalar_lea.hbm %s1702_s0, %s1200_s22 }
  0x36   : > { %s1284_s4 = scalar_lea.hbm %s1498_s30, %s1487_s11  ;;  %p1289_p2 = scmp.lt.s32.totalorder %s1498_s30, %s1702_s0 }
  0x37   : > { %p1285_p11 = scmp.ne.s32.totalorder %s1498_s30, %s1284_s4  ;;  %p1290_p0 = scmp.lt.s32.totalorder %s1288_s7, %s1284_s4 }
  0x39   : > { %p1286_p12 = pnand %p1285_p11, %p947_p5  ;;  %p1291_p7 = por %p1290_p0, %p1289_p2 }
  0x3b   : > { %p1287_p1 = pneg %p1286_p12 }
  0x3d   : > { %p1292_p3 = pnand %p1291_p7, %p1287_p1 }
  0x3f   : > { %1295 = shalt.err (!%p1292_p3)
}
  0x40   : > { %s1296_s10 = scalar_lea.vmem %s1500_s27, %s1487_s11  ;;  %s1383_s17 = smov [#allocation2]  }
  0x41   : > { %p1297_p8 = scmp.ne.s32.totalorder %s1500_s27, %s1296_s10  ;;  %s1300_s20 = sshll.u32 %s1383_s17, 4  ;;  %s1301_s20 = int_to_ptr.vmem [resolvable:$false] %s1300_s20 }
  0x42   : > { %s1302_s22 = scalar_lea.vmem %s1301_s20, 14336  ;;  %p1303_p11 = scmp.lt.s32.totalorder %s1500_s27, %s1301_s20 }
  0x43   : > { %p1298_p9 = pnand %p1297_p8, %p947_p5  ;;  %p1304_p12 = scmp.lt.s32.totalorder %s1302_s22, %s1296_s10 }
  0x45   : > { %p1299_p6 = pneg %p1298_p9  ;;  %p1305_p10 = por %p1304_p12, %p1303_p11 }
  0x47   : > { %p1306_p2 = pnand %p1305_p10, %p1299_p6 }
  0x49   : > { %1309 = shalt.err (!%p1306_p2)
}
  0x4a   : > { %s1384_s28 = smov 896   ;;  %s1385_s29 = smov 56  }
  0x4b   : > { %173 = dma.hbm_to_vmem [thread:$0]  (%p947_p5), %s1498_s30, %s1487_s11, %s1500_s27, %s1490_s19, %s1384_s28, %s1384_s28, %s1385_s29  }
  0x4c PF: > { %179 = sbr.rel (%p1469_p13) target bundleno = 416 (0x1a0), region = 32  ;;  %s1529_s4 = sand.u32 (!%p1469_p13), 1, %s1370_s13  }
  0x4d   : > { %s1201_s5 = smul.u32 (!%p1469_p13), 448, %s1529_s4  ;;  %s182_s6 = scalar_lea.sflag (!%p1469_p13), [#allocation3], %s1529_s4 }
  0x4e   : > { %p1713_p10 = scmp.ne.s32.totalorder (!%p1469_p13), %s1709_s23, 0 }
  0x4f   : > { %s1533_s7 = scalar_lea.vmem (!%p1469_p13), [#allocation2], %s1201_s5 }
  0x51   : > { %1353 = dma.done.wait (%p1713_p10), %s182_s6, 7168  }
  0x52   : > { %1355 = vsyncadd (%p1713_p10), %s182_s6, 4294960128 }
  0x53   : > { %1357 = dma.done.wait (%p41_p4), [#allocation6], 12544  }
  0x54   : > { %1359 = vsyncadd (%p41_p4), [#allocation6], 4294954752  ;;  %v310_v0 = vld [vmem:[#allocation5 + $0xf8] sm:$0xff]  ;;  %v309_v4 = vld [vmem:[#allocation5 + $0xf0] sm:$0xff]  ;;  %vm384_vm0 = vcmask 130048   ;;  %s953_s11 = sshll.u32 %s1529_s4, 6 }
  0x55   : > { %v342_v1 = vld [vmem:[#allocation5 + $0x1f8] sm:$0xff]  ;;  %973 = vmatprep.subr.mxu0 %v310_v0  ;;  %v341_v5 = vld [vmem:[#allocation5 + $0x1f0] sm:$0xff]  ;;  %v308_v8 = vld [vmem:[#allocation5 + $0xe8] sm:$0xff]  ;;  %s1624_s19 = scalar_lea.vmem [#allocation7], %s953_s11  ;;  %s838_s27 = scalar_lea.sflag [#allocation4], %s1529_s4 }
  0x56   : > { %v294_v2 = vld [vmem:[#allocation5 + $0x78] sm:$0xff]  ;;  %1029 = vmatprep.subr.mxu1 %v342_v1  ;;  %v293_v6 = vld [vmem:[#allocation5 + $0x70] sm:$0xff]  ;;  %v340_v9 = vld [vmem:[#allocation5 + $0x1e8] sm:$0xff]  ;;  %p1714_p4 = scmp.ne.s32.totalorder %s1710_s24, 0 }
  0x57   : > { %v326_v3 = vld [vmem:[#allocation5 + $0x178] sm:$0xff]  ;;  %974 = vmatpush3.msra.mxu0 %v294_v2  ;;  %v325_v7 = vld [vmem:[#allocation5 + $0x170] sm:$0xff]  ;;  %v292_v10 = vld [vmem:[#allocation5 + $0x68] sm:$0xff]  ;;  %s964_s30 = sshll.u32 (%p1714_p4), %s1430_s16, 3 }
  0x58   : > { %1030 = vmatpush3.msra.mxu1 %v326_v3  ;;  %975 = vmatprep.subr.mxu0 %v309_v4  ;;  %v324_v11 = vld [vmem:[#allocation5 + $0x168] sm:$0xff]  ;;  %v307_v12 = vld [vmem:[#allocation5 + $0xe0] sm:$0xff]  ;;  %v306_v16 = vld [vmem:[#allocation5 + $0xd8] sm:$0xff]  ;;  %s846_s8 = ssub.s32 (%p1714_p4), 13, %s964_s30 }
  0x59   : > { %1031 = vmatprep.subr.mxu1 %v341_v5  ;;  %976 = vmatpush3.msra.mxu0 %v293_v6  ;;  %v339_v13 = vld [vmem:[#allocation5 + $0x1e0] sm:$0xff]  ;;  %v338_v17 = vld [vmem:[#allocation5 + $0x1d8] sm:$0xff]  ;;  %v305_v20 = vld [vmem:[#allocation5 + $0xd0] sm:$0xff]  ;;  %p847_p13 = scmp.lt.s32.totalorder (%p1714_p4), %s846_s8, 8 }
  0x5a   : > { %1032 = vmatpush3.msra.mxu1 %v325_v7  ;;  %977 = vmatprep.subr.mxu0 %v308_v8  ;;  %v291_v14 = vld [vmem:[#allocation5 + $0x60] sm:$0xff]  ;;  %v290_v18 = vld [vmem:[#allocation5 + $0x58] sm:$0xff]  ;;  %v337_v21 = vld [vmem:[#allocation5 + $0x1d0] sm:$0xff] }
  0x5b   : > { %1033 = vmatprep.subr.mxu1 %v340_v9  ;;  %v323_v15 = vld [vmem:[#allocation5 + $0x160] sm:$0xff]  ;;  %978 = vmatpush3.msra.mxu0 %v292_v10  ;;  %v322_v19 = vld [vmem:[#allocation5 + $0x158] sm:$0xff]  ;;  %v289_v22 = vld [vmem:[#allocation5 + $0x50] sm:$0xff] }
  0x5c   : > { %1034 = vmatpush3.msra.mxu1 %v324_v11  ;;  %979 = vmatprep.subr.mxu0 %v307_v12  ;;  %v321_v23 = vld [vmem:[#allocation5 + $0x150] sm:$0xff]  ;;  %v304_v24 = vld [vmem:[#allocation5 + $0xc8] sm:$0xff]  ;;  %v303_v28 = vld [vmem:[#allocation5 + $0xc0] sm:$0xff] }
  0x5d   : > { %1035 = vmatprep.subr.mxu1 %v339_v13  ;;  %980 = vmatpush3.msra.mxu0 %v291_v14  ;;  %v336_v25 = vld [vmem:[#allocation5 + $0x1c8] sm:$0xff]  ;;  %v335_v29 = vld [vmem:[#allocation5 + $0x1c0] sm:$0xff]  ;;  %v302_v32 = vld [vmem:[#allocation5 + $0xb8] sm:$0xff] }
  0x5e   : > { %1036 = vmatpush3.msra.mxu1 %v323_v15  ;;  %981 = vmatprep.subr.mxu0 %v306_v16  ;;  %v288_v26 = vld [vmem:[#allocation5 + $0x48] sm:$0xff]  ;;  %v287_v30 = vld [vmem:[#allocation5 + $0x40] sm:$0xff]  ;;  %v334_v33 = vld [vmem:[#allocation5 + $0x1b8] sm:$0xff] }
  0x5f   : > { %1037 = vmatprep.subr.mxu1 %v338_v17  ;;  %982 = vmatpush3.msra.mxu0 %v290_v18  ;;  %v320_v27 = vld [vmem:[#allocation5 + $0x148] sm:$0xff]  ;;  %v319_v31 = vld [vmem:[#allocation5 + $0x140] sm:$0xff]  ;;  %v286_v34 = vld [vmem:[#allocation5 + $0x38] sm:$0xff] }
  0x60   : > { %1038 = vmatpush3.msra.mxu1 %v322_v19  ;;  %983 = vmatprep.subr.mxu0 %v305_v20  ;;  %v318_v35 = vld [vmem:[#allocation5 + $0x138] sm:$0xff]  ;;  %v301_v36 = vld [vmem:[#allocation5 + $0xb0] sm:$0xff]  ;;  %v300_v40 = vld [vmem:[#allocation5 + $0xa8] sm:$0xff] }
  0x61   : > { %1039 = vmatprep.subr.mxu1 %v337_v21  ;;  %984 = vmatpush3.msra.mxu0 %v289_v22  ;;  %v333_v37 = vld [vmem:[#allocation5 + $0x1b0] sm:$0xff]  ;;  %v332_v41 = vld [vmem:[#allocation5 + $0x1a8] sm:$0xff]  ;;  %v299_v44 = vld [vmem:[#allocation5 + $0xa0] sm:$0xff] }
  0x62   : > { %1040 = vmatpush3.msra.mxu1 %v321_v23  ;;  %985 = vmatprep.subr.mxu0 %v304_v24  ;;  %v285_v38 = vld [vmem:[#allocation5 + $0x30] sm:$0xff]  ;;  %v284_v42 = vld [vmem:[#allocation5 + $0x28] sm:$0xff]  ;;  %v331_v45 = vld [vmem:[#allocation5 + $0x1a0] sm:$0xff] }
  0x63   : > { %1041 = vmatprep.subr.mxu1 %v336_v25  ;;  %986 = vmatpush3.msra.mxu0 %v288_v26  ;;  %v317_v39 = vld [vmem:[#allocation5 + $0x130] sm:$0xff]  ;;  %v316_v43 = vld [vmem:[#allocation5 + $0x128] sm:$0xff]  ;;  %v283_v46 = vld [vmem:[#allocation5 + $0x20] sm:$0xff] }
  0x64   : > { %1042 = vmatpush3.msra.mxu1 %v320_v27  ;;  %987 = vmatprep.subr.mxu0 %v303_v28  ;;  %v315_v47 = vld [vmem:[#allocation5 + $0x120] sm:$0xff]  ;;  %v298_v48 = vld [vmem:[#allocation5 + $0x98] sm:$0xff]  ;;  %v297_v52 = vld [vmem:[#allocation5 + $0x90] sm:$0xff] }
  0x65   : > { %1043 = vmatprep.subr.mxu1 %v335_v29  ;;  %988 = vmatpush3.msra.mxu0 %v287_v30  ;;  %v330_v49 = vld [vmem:[#allocation5 + $0x198] sm:$0xff]  ;;  %v329_v53 = vld [vmem:[#allocation5 + $0x190] sm:$0xff]  ;;  %v296_v56 = vld [vmem:[#allocation5 + $0x88] sm:$0xff] }
  0x66   : > { %1044 = vmatpush3.msra.mxu1 %v319_v31  ;;  %989 = vmatprep.subr.mxu0 %v302_v32  ;;  %v282_v50 = vld [vmem:[#allocation5 + $0x18] sm:$0xff]  ;;  %v281_v54 = vld [vmem:[#allocation5 + $0x10] sm:$0xff]  ;;  %v328_v57 = vld [vmem:[#allocation5 + $0x188] sm:$0xff] }
  0x67   : > { %1045 = vmatprep.subr.mxu1 %v334_v33  ;;  %990 = vmatpush3.msra.mxu0 %v286_v34  ;;  %v314_v51 = vld [vmem:[#allocation5 + $0x118] sm:$0xff]  ;;  %v313_v55 = vld [vmem:[#allocation5 + $0x110] sm:$0xff]  ;;  %v280_v58 = vld [vmem:[#allocation5 + $0x8] sm:$0xff] }
  0x68   : > { %1046 = vmatpush3.msra.mxu1 %v318_v35  ;;  %991 = vmatprep.subr.mxu0 %v301_v36  ;;  %v312_v59 = vld [vmem:[#allocation5 + $0x108] sm:$0xff]  ;;  %v295_v60 = vld [vmem:[#allocation5 + $0x80] sm:$0xff]  ;;  %v226_v1 = vld [vmem:[%s1533_s7 + $0x18] sm:$0xff] }
  0x69   : > { %1047 = vmatprep.subr.mxu1 %v333_v37  ;;  %992 = vmatpush3.msra.mxu0 %v285_v38  ;;  %v327_v61 = vld [vmem:[#allocation5 + $0x180] sm:$0xff]  ;;  %v224_v63 = vld [vmem:[%s1533_s7 + $0x8] sm:$0xff]  ;;  %v225_v3 = vld [vmem:[%s1533_s7 + $0x10] sm:$0xff] }
  0x6a   : > { %1048 = vmatpush3.msra.mxu1 %v317_v39  ;;  %993 = vmatprep.subr.mxu0 %v300_v40  ;;  %v279_v62 = vld [vmem:[#allocation5] sm:$0xff]  ;;  %v374_v4 = vld [vmem:[#allocation5 + $0x2f8] sm:$0xff]  ;;  %v373_v6 = vld [vmem:[#allocation5 + $0x2f0] sm:$0xff] }
  0x6b   : > { %1049 = vmatprep.subr.mxu1 %v332_v41  ;;  %994 = vmatpush3.msra.mxu0 %v284_v42  ;;  %v311_v0 = vld [vmem:[#allocation5 + $0x100] sm:$0xff]  ;;  %v358_v5 = vld [vmem:[#allocation5 + $0x278] sm:$0xff]  ;;  %v233_v8 = vld [vmem:[%s1533_s7 + $0x50] sm:$0xff] }
  0x6c   : > { %1050 = vmatpush3.msra.mxu1 %v316_v43  ;;  %995 = vmatprep.subr.mxu0 %v299_v44  ;;  %v223_v2 = vld [vmem:[%s1533_s7] sm:$0xff]  ;;  %v357_v9 = vld [vmem:[#allocation5 + $0x270] sm:$0xff]  ;;  %v230_v10 = vld [vmem:[%s1533_s7 + $0x38] sm:$0xff] }
  0x6d   : > { %1051 = vmatprep.subr.mxu1 %v331_v45  ;;  %996 = vmatpush3.msra.mxu0 %v283_v46  ;;  %v231_v7 = vld [vmem:[%s1533_s7 + $0x40] sm:$0xff]  ;;  %v232_v11 = vld [vmem:[%s1533_s7 + $0x48] sm:$0xff]  ;;  %v238_v15 = vld [vmem:[%s1533_s7 + $0x78] sm:$0xff] }
  0x6e   : > { %1052 = vmatpush3.msra.mxu1 %v315_v47  ;;  %997 = vmatprep.subr.mxu0 %v298_v48  ;;  %v372_v12 = vld [vmem:[#allocation5 + $0x2e8] sm:$0xff]  ;;  %v371_v14 = vld [vmem:[#allocation5 + $0x2e0] sm:$0xff]  ;;  %v237_v18 = vld [vmem:[%s1533_s7 + $0x70] sm:$0xff] }
  0x6f   : > { %1053 = vmatprep.subr.mxu1 %v330_v49  ;;  %998 = vmatpush3.msra.mxu0 %v282_v50  ;;  %v356_v13 = vld [vmem:[#allocation5 + $0x268] sm:$0xff]  ;;  %v355_v17 = vld [vmem:[#allocation5 + $0x260] sm:$0xff]  ;;  %v370_v20 = vld [vmem:[#allocation5 + $0x2d8] sm:$0xff] }
  0x70   : > { %1054 = vmatpush3.msra.mxu1 %v314_v51  ;;  %999 = vmatprep.subr.mxu0 %v297_v52  ;;  %v240_v16 = vld [vmem:[%s1533_s7 + $0x88] sm:$0xff]  ;;  %v239_v19 = vld [vmem:[%s1533_s7 + $0x80] sm:$0xff]  ;;  %v354_v21 = vld [vmem:[#allocation5 + $0x258] sm:$0xff] }
  0x71   : > { %1055 = vmatprep.subr.mxu1 %v329_v53  ;;  %1000 = vmatpush3.msra.mxu0 %v281_v54  ;;  %v369_v22 = vld [vmem:[#allocation5 + $0x2d0] sm:$0xff]  ;;  %v247_v24 = vld [vmem:[%s1533_s7 + $0xc0] sm:$0xff]  ;;  %v244_v26 = vld [vmem:[%s1533_s7 + $0xa8] sm:$0xff] }
  0x72   : > { %1056 = vmatpush3.msra.mxu1 %v313_v55  ;;  %1001 = vmatprep.subr.mxu0 %v296_v56  ;;  %v245_v23 = vld [vmem:[%s1533_s7 + $0xb0] sm:$0xff]  ;;  %v246_v27 = vld [vmem:[%s1533_s7 + $0xb8] sm:$0xff]  ;;  %v368_v28 = vld [vmem:[#allocation5 + $0x2c8] sm:$0xff] }
  0x73   : > { %1057 = vmatprep.subr.mxu1 %v328_v57  ;;  %1002 = vmatpush3.msra.mxu0 %v280_v58  ;;  %v353_v25 = vld [vmem:[#allocation5 + $0x250] sm:$0xff]  ;;  %v352_v29 = vld [vmem:[#allocation5 + $0x248] sm:$0xff]  ;;  %v367_v30 = vld [vmem:[#allocation5 + $0x2c0] sm:$0xff] }
  0x74   : > { %1058 = vmatpush3.msra.mxu1 %v312_v59  ;;  %1003 = vmatprep.subr.mxu0 %v295_v60  ;;  %v252_v31 = vld [vmem:[%s1533_s7 + $0xe8] sm:$0xff]  ;;  %v254_v32 = vld [vmem:[%s1533_s7 + $0xf8] sm:$0xff]  ;;  %v351_v33 = vld [vmem:[#allocation5 + $0x240] sm:$0xff] }
  0x75   : > { %1059 = vmatprep.subr.mxu1 %v327_v61  ;;  %1004 = vmatpush3.msra.mxu0 %v279_v62  ;;  %v251_v34 = vld [vmem:[%s1533_s7 + $0xe0] sm:$0xff]  ;;  %v253_v35 = vld [vmem:[%s1533_s7 + $0xf0] sm:$0xff]  ;;  %v366_v36 = vld [vmem:[#allocation5 + $0x2b8] sm:$0xff] }
  0x76   : > { %473 = vmatprep.mubr.f32.mxu0 %v224_v63  ;;  %1060 = vmatpush3.msra.mxu1 %v311_v0  ;;  %v350_v37 = vld [vmem:[#allocation5 + $0x238] sm:$0xff]  ;;  %v365_v38 = vld [vmem:[#allocation5 + $0x2b0] sm:$0xff]  ;;  %v259_v39 = vld [vmem:[%s1533_s7 + $0x120] sm:$0xff] }
  0x77   : > { %578 = vmatprep.mubr.f32.mxu1 %v226_v1  ;;  %474 = vmatmul.mubr.f32.vlgmr.msra.gmra.mxu0 %v223_v2  ;;  %v261_v40 = vld [vmem:[%s1533_s7 + $0x130] sm:$0xff]  ;;  %v258_v42 = vld [vmem:[%s1533_s7 + $0x118] sm:$0xff]  ;;  %v260_v43 = vld [vmem:[%s1533_s7 + $0x128] sm:$0xff] }
  0x78   : > { %579 = vmatmul.mubr.f32.vlgmr.msra.gmra.mxu1 %v225_v3  ;;  %1085 = vmatprep.subr.mxu0 %v374_v4  ;;  %v349_v41 = vld [vmem:[#allocation5 + $0x230] sm:$0xff]  ;;  %v364_v44 = vld [vmem:[#allocation5 + $0x2a8] sm:$0xff]  ;;  %v363_v46 = vld [vmem:[#allocation5 + $0x2a0] sm:$0xff] }
  0x79   : > { %1167 = vmatprep.subr.mxu1 %v374_v4  ;;  %1086 = vmatpush3.msra.mxu0 %v358_v5  ;;  %v348_v45 = vld [vmem:[#allocation5 + $0x228] sm:$0xff]  ;;  %v266_v47 = vld [vmem:[%s1533_s7 + $0x158] sm:$0xff]  ;;  %v347_v49 = vld [vmem:[#allocation5 + $0x220] sm:$0xff] }
  0x7a   : > { %1183 = vmatpush3.msra.mxu1 %v358_v5  ;;  %1087 = vmatprep.subr.mxu0 %v373_v6  ;;  %v268_v48 = vld [vmem:[%s1533_s7 + $0x168] sm:$0xff]  ;;  %v265_v50 = vld [vmem:[%s1533_s7 + $0x150] sm:$0xff]  ;;  %v267_v51 = vld [vmem:[%s1533_s7 + $0x160] sm:$0xff] }
  0x7b   : > { %1168 = vmatprep.subr.mxu1 %v373_v6  ;;  %478 = vmatprep.mubr.f32.mxu0 %v231_v7  ;;  %v362_v52 = vld [vmem:[#allocation5 + $0x298] sm:$0xff]  ;;  %v361_v54 = vld [vmem:[#allocation5 + $0x290] sm:$0xff]  ;;  %v275_v56 = vld [vmem:[%s1533_s7 + $0x1a0] sm:$0xff] }
  0x7c   : > { %583 = vmatprep.mubr.f32.mxu1 %v233_v8  ;;  %1088 = vmatpush3.msra.mxu0 %v357_v9  ;;  %v346_v53 = vld [vmem:[#allocation5 + $0x218] sm:$0xff]  ;;  %v273_v55 = vld [vmem:[%s1533_s7 + $0x190] sm:$0xff]  ;;  %v272_v58 = vld [vmem:[%s1533_s7 + $0x188] sm:$0xff] }
  0x7d   : > { %1184 = vmatpush3.msra.mxu1 %v357_v9  ;;  %479 = vmatmul.mubr.f32.gmra.mxu0 %v230_v10  ;;  %v345_v57 = vld [vmem:[#allocation5 + $0x210] sm:$0xff]  ;;  %v274_v59 = vld [vmem:[%s1533_s7 + $0x198] sm:$0xff]  ;;  %v360_v60 = vld [vmem:[#allocation5 + $0x288] sm:$0xff] }
  0x7e   : > { %584 = vmatmul.mubr.f32.gmra.mxu1 %v232_v11  ;;  %1089 = vmatprep.subr.mxu0 %v372_v12  ;;  %v344_v61 = vld [vmem:[#allocation5 + $0x208] sm:$0xff]  ;;  %v359_v62 = vld [vmem:[#allocation5 + $0x280] sm:$0xff]  ;;  %v270_v1 = vld [vmem:[%s1533_s7 + $0x178] sm:$0xff] }
  0x7f   : > { %1169 = vmatprep.subr.mxu1 %v372_v12  ;;  %1090 = vmatpush3.msra.mxu0 %v356_v13  ;;  %v343_v63 = vld [vmem:[#allocation5 + $0x200] sm:$0xff]  ;;  %v228_v0 = vld [vmem:[%s1533_s7 + $0x28] sm:$0xff]  ;;  %v269_v3 = vld [vmem:[%s1533_s7 + $0x170] sm:$0xff] }
  0x80   : > { %1185 = vmatpush3.msra.mxu1 %v356_v13  ;;  %1091 = vmatprep.subr.mxu0 %v371_v14  ;;  %v227_v2 = vld [vmem:[%s1533_s7 + $0x20] sm:$0xff]  ;;  %v277_v5 = vld [vmem:[%s1533_s7 + $0x1b0] sm:$0xff]  ;;  %v376_v6 = vld [vmem:[#allocation5 + $0x308] sm:$0xff] }
  0x81   : > { %1170 = vmatprep.subr.mxu1 %v371_v14  ;;  %483 = vmatprep.mubr.f32.mxu0 %v238_v15  ;;  %v235_v4 = vld [vmem:[%s1533_s7 + $0x60] sm:$0xff]  ;;  %v234_v7 = vld [vmem:[%s1533_s7 + $0x58] sm:$0xff]  ;;  %v276_v8 = vld [vmem:[%s1533_s7 + $0x1a8] sm:$0xff] }
  0x82   : > { %588 = vmatprep.mubr.f32.mxu1 %v240_v16  ;;  %1092 = vmatpush3.msra.mxu0 %v355_v17  ;;  %v375_v9 = vld [vmem:[#allocation5 + $0x300] sm:$0xff]  ;;  %v242_v10 = vld [vmem:[%s1533_s7 + $0x98] sm:$0xff]  ;;  %v229_v11 = vld [vmem:[%s1533_s7 + $0x30] sm:$0xff] }
  0x83   : > { %1186 = vmatpush3.msra.mxu1 %v355_v17  ;;  %484 = vmatmul.mubr.f32.gmra.mxu0 %v237_v18  ;;  %v241_v12 = vld [vmem:[%s1533_s7 + $0x90] sm:$0xff]  ;;  %v236_v13 = vld [vmem:[%s1533_s7 + $0x68] sm:$0xff]  ;;  %v243_v15 = vld [vmem:[%s1533_s7 + $0xa0] sm:$0xff] }
  0x84   : > { %589 = vmatmul.mubr.f32.gmra.mxu1 %v239_v19  ;;  %1093 = vmatprep.subr.mxu0 %v370_v20  ;;  %v249_v14 = vld [vmem:[%s1533_s7 + $0xd0] sm:$0xff]  ;;  %v248_v16 = vld [vmem:[%s1533_s7 + $0xc8] sm:$0xff]  ;;  %v250_v17 = vld [vmem:[%s1533_s7 + $0xd8] sm:$0xff] }
  0x85   : > { %1171 = vmatprep.subr.mxu1 %v370_v20  ;;  %1094 = vmatpush3.msra.mxu0 %v354_v21  ;;  %v256_v18 = vld [vmem:[%s1533_s7 + $0x108] sm:$0xff]  ;;  %v257_v19 = vld [vmem:[%s1533_s7 + $0x110] sm:$0xff]  ;;  %v255_v20 = vld [vmem:[%s1533_s7 + $0x100] sm:$0xff] }
  0x86   : > { %1187 = vmatpush3.msra.mxu1 %v354_v21  ;;  %1095 = vmatprep.subr.mxu0 %v369_v22  ;;  %v264_v21 = vld [vmem:[%s1533_s7 + $0x148] sm:$0xff] }
  0x87   : > { %1172 = vmatprep.subr.mxu1 %v369_v22  ;;  %488 = vmatprep.mubr.f32.mxu0 %v245_v23  ;;  %v263_v22 = vld [vmem:[%s1533_s7 + $0x140] sm:$0xff] }
  0x88   : > { %593 = vmatprep.mubr.f32.mxu1 %v247_v24  ;;  %1096 = vmatpush3.msra.mxu0 %v353_v25  ;;  %v271_v23 = vld [vmem:[%s1533_s7 + $0x180] sm:$0xff]  ;;  %v262_v24 = vld [vmem:[%s1533_s7 + $0x138] sm:$0xff] }
  0x89   : > { %1188 = vmatpush3.msra.mxu1 %v353_v25  ;;  %489 = vmatmul.mubr.f32.gmra.mxu0 %v244_v26  ;;  %v278_v25 = vld [vmem:[%s1533_s7 + $0x1b8] sm:$0xff] }
  0x8a   : > { %594 = vmatmul.mubr.f32.gmra.mxu1 %v246_v27  ;;  %1097 = vmatprep.subr.mxu0 %v368_v28 }
  0x8b   : > { %1173 = vmatprep.subr.mxu1 %v368_v28  ;;  %1098 = vmatpush3.msra.mxu0 %v352_v29 }
  0x8c   : > { %1189 = vmatpush3.msra.mxu1 %v352_v29  ;;  %1099 = vmatprep.subr.mxu0 %v367_v30 }
  0x8d   : > { %1174 = vmatprep.subr.mxu1 %v367_v30  ;;  %493 = vmatprep.mubr.f32.mxu0 %v252_v31 }
  0x8e   : > { %598 = vmatprep.mubr.f32.mxu1 %v254_v32  ;;  %1100 = vmatpush3.msra.mxu0 %v351_v33 }
  0x8f   : > { %1190 = vmatpush3.msra.mxu1 %v351_v33  ;;  %494 = vmatmul.mubr.f32.gmra.mxu0 %v251_v34 }
  0x90   : > { %599 = vmatmul.mubr.f32.gmra.mxu1 %v253_v35  ;;  %1101 = vmatprep.subr.mxu0 %v366_v36 }
  0x91   : > { %1175 = vmatprep.subr.mxu1 %v366_v36  ;;  %1102 = vmatpush3.msra.mxu0 %v350_v37 }
  0x92   : > { %1191 = vmatpush3.msra.mxu1 %v350_v37  ;;  %1103 = vmatprep.subr.mxu0 %v365_v38 }
  0x93   : > { %1176 = vmatprep.subr.mxu1 %v365_v38  ;;  %498 = vmatprep.mubr.f32.mxu0 %v259_v39 }
  0x94   : > { %603 = vmatprep.mubr.f32.mxu1 %v261_v40  ;;  %1104 = vmatpush3.msra.mxu0 %v349_v41 }
  0x95   : > { %1192 = vmatpush3.msra.mxu1 %v349_v41  ;;  %499 = vmatmul.mubr.f32.gmra.mxu0 %v258_v42 }
  0x96   : > { %604 = vmatmul.mubr.f32.gmra.mxu1 %v260_v43  ;;  %1105 = vmatprep.subr.mxu0 %v364_v44 }
  0x97   : > { %1177 = vmatprep.subr.mxu1 %v364_v44  ;;  %1106 = vmatpush3.msra.mxu0 %v348_v45 }
  0x98   : > { %1193 = vmatpush3.msra.mxu1 %v348_v45  ;;  %1107 = vmatprep.subr.mxu0 %v363_v46 }
  0x99   : > { %1178 = vmatprep.subr.mxu1 %v363_v46  ;;  %503 = vmatprep.mubr.f32.mxu0 %v266_v47 }
  0x9a   : > { %608 = vmatprep.mubr.f32.mxu1 %v268_v48  ;;  %1108 = vmatpush3.msra.mxu0 %v347_v49 }
  0x9b   : > { %1194 = vmatpush3.msra.mxu1 %v347_v49  ;;  %504 = vmatmul.mubr.f32.gmra.mxu0 %v265_v50 }
  0x9c   : > { %609 = vmatmul.mubr.f32.gmra.mxu1 %v267_v51  ;;  %1109 = vmatprep.subr.mxu0 %v362_v52 }
  0x9d   : > { %1179 = vmatprep.subr.mxu1 %v362_v52  ;;  %1110 = vmatpush3.msra.mxu0 %v346_v53 }
  0x9e   : > { %1195 = vmatpush3.msra.mxu1 %v346_v53  ;;  %1111 = vmatprep.subr.mxu0 %v361_v54 }
  0x9f   : > { %1180 = vmatprep.subr.mxu1 %v361_v54  ;;  %508 = vmatprep.mubr.f32.mxu0 %v273_v55 }
  0xa0   : > { %613 = vmatprep.mubr.f32.mxu1 %v275_v56  ;;  %1112 = vmatpush3.msra.mxu0 %v345_v57 }
  0xa1   : > { %1196 = vmatpush3.msra.mxu1 %v345_v57  ;;  %509 = vmatmul.mubr.f32.gmra.mxu0 %v272_v58 }
  0xa2   : > { %614 = vmatmul.mubr.f32.gmra.mxu1 %v274_v59  ;;  %1113 = vmatprep.subr.mxu0 %v360_v60 }
  0xa3   : > { %1181 = vmatprep.subr.mxu1 %v360_v60  ;;  %1114 = vmatpush3.msra.mxu0 %v344_v61  ;;  %v1616_v60 = vld [vmem:[%s1704_s2] ss:$0 sm:$0xff] }
  0xa4   : > { %1197 = vmatpush3.msra.mxu1 %v344_v61  ;;  %1115 = vmatprep.subr.mxu0 %v359_v62 }
  0xa5   : > { %1182 = vmatprep.subr.mxu1 %v359_v62  ;;  %1116 = vmatpush3.msra.mxu0 %v343_v63 }
  0xa6   : > { %1198 = vmatpush3.msra.mxu1 %v343_v63  ;;  %683 = vmatprep.mubr.f32.mxu0 %v228_v0 }
  0xa7   : > { %713 = vmatprep.mubr.f32.mxu1 %v270_v1  ;;  %684 = vmatmul.mubr.f32.vlgmr.msra.gmra.mxu0 %v227_v2 }
  0xa8   : > { %714 = vmatmul.mubr.f32.vlgmr.msra.gmra.mxu1 %v269_v3  ;;  %688 = vmatprep.mubr.f32.mxu0 %v235_v4 }
  0xa9   : > { %718 = vmatprep.mubr.f32.mxu1 %v277_v5  ;;  %1151 = vmatprep.subr.mxu1 %v376_v6 }
  0xaa   : > { %1152 = vmatpush3.msra.mxu1 %v376_v6 }
  0xab   : > { %689 = vmatmul.mubr.f32.gmra.mxu0 %v234_v7  ;;  %1153 = vmatprep.subr.mxu1 %v375_v9 }
  0xac   : > { %719 = vmatmul.mubr.f32.gmra.mxu1 %v276_v8  ;;  %693 = vmatprep.mubr.f32.mxu0 %v242_v10 }
  0xad   : > { %1154 = vmatpush3.msra.mxu1 %v375_v9  ;;  %1155 = vmatprep.mubr.msk.f32.mxu1 %vm384_vm0, %v229_v11 }
  0xaf   : > { %694 = vmatmul.mubr.f32.gmra.mxu0 %v241_v12 }
  0xb0   : > { %1156 = vmatmul.mubr.msk.f32.vlgmr.msra.gmra.mxu1 %vm384_vm0, %v236_v13  ;;  %698 = vmatprep.mubr.f32.mxu0 %v249_v14 }
  0xb1   : > { %1158 = vmatprep.mubr.msk.f32.mxu1 %vm384_vm0, %v243_v15 }
  0xb3   : > { %699 = vmatmul.mubr.f32.gmra.mxu0 %v248_v16 }
  0xb4   : > { %1159 = vmatmul.mubr.msk.f32.gmra.mxu1 %vm384_vm0, %v250_v17  ;;  %703 = vmatprep.mubr.f32.mxu0 %v256_v18 }
  0xb5   : > { %1161 = vmatprep.mubr.msk.f32.mxu1 %vm384_vm0, %v257_v19 }
  0xb7   : > { %704 = vmatmul.mubr.f32.gmra.mxu0 %v255_v20 }
  0xb8   : > { %1162 = vmatmul.mubr.msk.f32.gmra.mxu1 %vm384_vm0, %v264_v21  ;;  %708 = vmatprep.mubr.f32.mxu0 %v263_v22 }
  0xb9   : > { %1164 = vmatprep.mubr.msk.f32.mxu1 %vm384_vm0, %v271_v23 }
  0xbb   : > { %709 = vmatmul.mubr.f32.gmra.mxu0 %v262_v24 }
  0xbc   : > { %1165 = vmatmul.mubr.msk.f32.gmra.mxu1 %vm384_vm0, %v278_v25 }
 0x137   : > { %v1005_v26 = vpop.f32.mrf.mxu0 }
 0x138   : > { %v1061_v27 = vpop.f32.mrf.mxu1 }
 0x139   : > { %v1006_v28 = vpop.f32.mrf.mxu0 }
 0x13a   : > { %v1062_v29 = vpop.f32.mrf.mxu1  ;;  %v1007_v58 = vadd.f32 %v1006_v28, %v1005_v26 }
 0x13b   : > { %v1063_v3 = vadd.f32 %v1062_v29, %v1061_v27 }
 0x13c   : > { %v476_v2 = vadd.f32 %v1007_v58, %v1616_v60 }
 0x13d   : > { %v1008_v30 = vpop.f32.mrf.mxu0 }
 0x13e   : > { %v1064_v31 = vpop.f32.mrf.mxu1  ;;  %v581_v14 = vadd.f32 %v1063_v3, %v476_v2 }
 0x13f   : > { %v1009_v32 = vpop.f32.mrf.mxu0 }
 0x140   : > { %v1065_v33 = vpop.f32.mrf.mxu1  ;;  %v1010_v59 = vadd.f32 %v1009_v32, %v1008_v30 }
 0x141   : > { %v1066_v5 = vadd.f32 %v1065_v33, %v1064_v31 }
 0x142   : > { %v481_v4 = vadd.f32 %v1010_v59, %v1616_v60 }
 0x143   : > { %v1011_v34 = vpop.f32.mrf.mxu0 }
 0x144   : > { %v1067_v35 = vpop.f32.mrf.mxu1  ;;  %v586_v15 = vadd.f32 %v1066_v5, %v481_v4 }
 0x145   : > { %v1012_v36 = vpop.f32.mrf.mxu0 }
 0x146   : > { %v1068_v37 = vpop.f32.mrf.mxu1  ;;  %v1013_v63 = vadd.f32 %v1012_v36, %v1011_v34 }
 0x147   : > { %v1069_v11 = vadd.f32 %v1068_v37, %v1067_v35 }
 0x148   : > { %v486_v10 = vadd.f32 %v1013_v63, %v1616_v60 }
 0x149   : > { %v1014_v38 = vpop.f32.mrf.mxu0 }
 0x14a   : > { %v1070_v39 = vpop.f32.mrf.mxu1  ;;  %v591_v24 = vadd.f32 %v1069_v11, %v486_v10 }
 0x14b   : > { %v1015_v40 = vpop.f32.mrf.mxu0 }
 0x14c   : > { %v1071_v41 = vpop.f32.mrf.mxu1  ;;  %v1016_v8 = vadd.f32 %v1015_v40, %v1014_v38 }
 0x14d   : > { %v1072_v17 = vadd.f32 %v1071_v41, %v1070_v39 }
 0x14e   : > { %v491_v20 = vadd.f32 %v1016_v8, %v1616_v60 }
 0x14f   : > { %v1017_v42 = vpop.f32.mrf.mxu0 }
 0x150   : > { %v1607_v43 = vpop.f32.mrf.mxu1  ;;  %v596_v34 = vadd.f32 %v1072_v17, %v491_v20 }
 0x151   : > { %v1018_v44 = vpop.f32.mrf.mxu0 }
 0x152   : > { %v1074_v45 = vpop.f32.mrf.mxu1  ;;  %v1019_v25 = vadd.f32 %v1018_v44, %v1017_v42 }
 0x153   : > { %v1075_v39 = vadd.f32 %v1074_v45, %v1607_v43 }
 0x154   : > { %v496_v38 = vadd.f32 %v1019_v25, %v1616_v60 }
 0x155   : > { %v1020_v46 = vpop.f32.mrf.mxu0 }
 0x156   : > { %v1609_v47 = vpop.f32.mrf.mxu1  ;;  %v601_v63 = vadd.f32 %v1075_v39, %v496_v38 }
 0x157   : > { %v1021_v48 = vpop.f32.mrf.mxu0 }
 0x158   : > { %v1611_v49 = vpop.f32.mrf.mxu1  ;;  %v1022_v40 = vadd.f32 %v1021_v48, %v1020_v46 }
 0x159   : > { %v1078_v43 = vadd.f32 %v1611_v49, %v1609_v47 }
 0x15b   : > { %v1023_v50 = vpop.f32.mrf.mxu0 }
 0x15c   : > { %v1079_v51 = vpop.f32.mrf.mxu1 }
 0x15d   : > { %v1024_v52 = vpop.f32.mrf.mxu0 }
 0x15e   : > { %v1080_v53 = vpop.f32.mrf.mxu1  ;;  %v1025_v28 = vadd.f32 %v1024_v52, %v1023_v50 }
 0x15f   : > { %v1081_v41 = vadd.f32 %v1080_v53, %v1079_v51 }
 0x160   : > { %v506_v50 = vadd.f32 %v1025_v28, %v1616_v60 }
 0x161   : > { %v1026_v54 = vpop.f32.mrf.mxu0 }
 0x162   : > { %v1082_v55 = vpop.f32.mrf.mxu1  ;;  %v611_v48 = vadd.f32 %v1081_v41, %v506_v50 }
 0x163   : > { %v1027_v56 = vpop.f32.mrf.mxu0 }
 0x164   : > { %v1083_v57 = vpop.f32.mrf.mxu1  ;;  %v1028_v21 = vadd.f32 %v1027_v56, %v1026_v54 }
 0x165   : > { %v1084_v36 = vadd.f32 %v1083_v57, %v1082_v55 }
 0x166   : > { %v511_v35 = vadd.f32 %v1028_v21, %v1616_v60 }
 0x167   : > { %v1117_v61 = vpop.f32.mrf.mxu0 }
 0x168   : > { %v1135_v62 = vpop.f32.mrf.mxu1  ;;  %v616_v58 = vadd.f32 %v1084_v36, %v511_v35 }
 0x169   : > { %v1118_v0 = vpop.f32.mrf.mxu0 }
 0x16a   : > { %v1136_v1 = vpop.f32.mrf.mxu1  ;;  %v1119_v9 = vadd.f32 %v1118_v0, %v1117_v61  ;;  %v501_v0 = vadd.f32 %v1022_v40, %v1616_v60 }
 0x16b   : > { %v1120_v6 = vpop.f32.mrf.mxu0  ;;  %v1137_v59 = vadd.f32 %v1136_v1, %v1135_v62 }
 0x16c   : > { %v1138_v7 = vpop.f32.mrf.mxu1  ;;  %v686_v23 = vadd.f32 %v1119_v9, %v581_v14  ;;  %v606_v47 = vadd.f32 %v1078_v43, %v501_v0 }
 0x16d   : > { %v1121_v12 = vpop.f32.mrf.mxu0  ;;  %v716_v60 = vadd.f32 %v1137_v59, %v611_v48 }
 0x16e   : > { %v1139_v13 = vpop.f32.mrf.mxu1  ;;  %v1122_v16 = vadd.f32 %v1121_v12, %v1120_v6 }
 0x16f   : > { %v1123_v18 = vpop.f32.mrf.mxu0  ;;  %v1140_v52 = vadd.f32 %v1139_v13, %v1138_v7 }
 0x170   : > { %v1157_v19 = vpop.f32.mrf.mxu1  ;;  %v691_v22 = vadd.f32 %v1122_v16, %v586_v15 }
 0x171   : > { %v1124_v26 = vpop.f32.mrf.mxu0  ;;  %v721_v2 = vadd.f32 %v1140_v52, %v616_v58 }
 0x172   : > { %v790_v27 = vpop.f32.mrf.mxu1  ;;  %v796_v29 = vadd.f32 %v1157_v19, %v691_v22  ;;  %v1125_v30 = vadd.f32 %v1124_v26, %v1123_v18 }
 0x173   : > { %v791_v31 = vadd.f32 %v790_v27, %v686_v23  ;;  %v1126_v32 = vpop.f32.mrf.mxu0 }
 0x174   : > { %v1160_v33 = vpop.f32.mrf.mxu1  ;;  %830 = vst [vmem:[%s1624_s19 + $0x8] sm:$0xff] %v796_v29  ;;  %v696_v37 = vadd.f32 %v1125_v30, %v591_v24 }
 0x175   : > { %829 = vst [vmem:[%s1624_s19] sm:$0xff] %v791_v31  ;;  %v1127_v42 = vpop.f32.mrf.mxu0 }
 0x176   : > { %v800_v44 = vpop.f32.mrf.mxu1  ;;  %v1128_v54 = vadd.f32 %v1127_v42, %v1126_v32 }
 0x177   : > { %v801_v55 = vadd.f32 %v800_v44, %v696_v37  ;;  %v1129_v56 = vpop.f32.mrf.mxu0 }
 0x178   : > { %v1163_v57 = vpop.f32.mrf.mxu1  ;;  %v701_v61 = vadd.f32 %v1128_v54, %v596_v34 }
 0x179   : > { %831 = vst [vmem:[%s1624_s19 + $0x10] sm:$0xff] %v801_v55  ;;  %v1130_v45 = vpop.f32.mrf.mxu0 }
 0x17a   : > { %v810_v46 = vpop.f32.mrf.mxu1  ;;  %v806_v51 = vadd.f32 %v1160_v33, %v701_v61  ;;  %v1131_v53 = vadd.f32 %v1130_v45, %v1129_v56 }
 0x17b   : > { %v1132_v3 = vpop.f32.mrf.mxu0 }
 0x17c   : > { %v1166_v4 = vpop.f32.mrf.mxu1  ;;  %832 = vst [vmem:[%s1624_s19 + $0x18] sm:$0xff] %v806_v51  ;;  %v706_v62 = vadd.f32 %v1131_v53, %v601_v63 }
 0x17d   : > { %v826_v1 = vadd.f32 %v1166_v4, %v721_v2  ;;  %v1133_v5 = vpop.f32.mrf.mxu0 }
 0x17e   : > { %v820_v6 = vpop.f32.mrf.mxu1  ;;  %v811_v49 = vadd.f32 %v810_v46, %v706_v62  ;;  %v1134_v7 = vadd.f32 %v1133_v5, %v1132_v3 }
 0x17f   : > { %836 = vst [vmem:[%s1624_s19 + $0x38] sm:$0xff] %v826_v1  ;;  %v821_v8 = vadd.f32 %v820_v6, %v716_v60 }
 0x180   : > { %833 = vst [vmem:[%s1624_s19 + $0x20] sm:$0xff] %v811_v49  ;;  %v711_v9 = vadd.f32 %v1134_v7, %v606_v47  ;;  %844 = sbr.rel (!%p1714_p4) target bundleno = 416 (0x1a0), region = 44 }
 0x181   : > { %835 = vst [vmem:[%s1624_s19 + $0x30] sm:$0xff] %v821_v8 }
 0x182   : > { %v816_v10 = vadd.f32 %v1163_v57, %v711_v9 }
 0x184   : > { %834 = vst [vmem:[%s1624_s19 + $0x28] sm:$0xff] %v816_v10 }
 0x185   : > { %s1724_s8 = smov (!%p847_p13, %s846_s8), 8 }
 0x186   : > { %s1644_s9 = sshll.u32 %s1724_s8, 7 }
 0x187   : > { %s851_s10 = ssub.s32 1024, %s1644_s9 }
 0x188   : > { %852 = vsyncadd %s838_s27, %s851_s10  ;;  %p966_p5 = scmp.ne.s32.totalorder %s1644_s9, 0  ;;  %s972_s24 = sshll.u32 %s1430_s16, 10 }
 0x189   : > { %s1654_s22 = scalar_lea.hbm %s1705_s3, %s972_s24  ;;  %s857_s28 = sshll.u32 %s1624_s19, 4  ;;  %s1657_s28 = int_to_ptr.vmem [resolvable:$true] %s857_s28 }
 0x18a   : > { %s1310_s29 = scalar_lea.vmem %s1657_s28, %s1644_s9  ;;  %s1386_s5 = smov [#allocation7]  }
 0x18b   : > { %p1311_p1 = scmp.ne.s32.totalorder %s1657_s28, %s1310_s29  ;;  %s1314_s6 = sshll.u32 %s1386_s5, 4  ;;  %s1315_s6 = int_to_ptr.vmem [resolvable:$false] %s1314_s6 }
 0x18c   : > { %s1316_s16 = scalar_lea.vmem %s1315_s6, 2048  ;;  %p1317_p3 = scmp.lt.s32.totalorder %s1657_s28, %s1315_s6 }
 0x18d   : > { %p1312_p0 = pnand %p1311_p1, %p966_p5  ;;  %p1318_p8 = scmp.lt.s32.totalorder %s1316_s16, %s1310_s29 }
 0x18f   : > { %p1313_p7 = pneg %p1312_p0  ;;  %p1319_p9 = por %p1318_p8, %p1317_p3 }
 0x191   : > { %p1320_p6 = pnand %p1319_p9, %p1313_p7 }
 0x193   : > { %1323 = shalt.err (!%p1320_p6)
}
 0x194   : > { %s1324_s7 = scalar_lea.hbm %s1654_s22, %s1644_s9  ;;  %s1328_s11 = scalar_lea.hbm %s1705_s3, 1664 }
 0x195   : > { %p1325_p11 = scmp.ne.s32.totalorder %s1654_s22, %s1324_s7  ;;  %p1329_p10 = scmp.lt.s32.totalorder %s1654_s22, %s1705_s3 }
 0x196   : > { %p1330_p4 = scmp.lt.s32.totalorder %s1328_s11, %s1324_s7 }
 0x197   : > { %p1326_p12 = pnand %p1325_p11, %p966_p5 }
 0x198   : > { %p1331_p13 = por %p1330_p4, %p1329_p10 }
 0x199   : > { %p1327_p2 = pneg %p1326_p12 }
 0x19b   : > { %p1332_p1 = pnand %p1331_p13, %p1327_p2 }
 0x19d   : > { %1335 = shalt.err (!%p1332_p1)
}
 0x19e   : > { %s1387_s8 = smov 128   ;;  %s1388_s10 = smov 8  }
 0x19f   : > { %863 = dma.vmem_to_hbm [thread:$0]  (%p966_p5), %s1657_s28, %s1644_s9, %s1654_s22, %s838_s27, %s1387_s8, %s1387_s8, %s1388_s10  }
 0x1a0 PF: > { %s872_s24 = sand.u32 1, %s1366_s12   ;;  %p1715_p0 = scmp.ne.s32.totalorder %s1711_s25, 0 }
 0x1a1   : > { %p1716_p7 = scmp.ge.s32.totalorder %s1378_s15, 2  ;;  %s873_s17 = scalar_lea.sflag [#allocation4], %s872_s24 }
 0x1a3   : > { %p1213_p3 = pnand %p1716_p7, %p1715_p0 }
 0x1a5   : > { %p1214_p8 = pneg %p1213_p3 }
 0x1a7   : > { %1361 = dma.done.wait (%p1214_p8), %s873_s17, 1024  }
 0x1a8   : > { %1363 = vsyncadd (%p1214_p8), %s873_s17, 4294966272  ;;  %p17_p9 = scmp.ge.s32.totalorder %s1434_s18, 4   ;;  %s1717_s12 = smov %s1370_s13 }
 0x1a9   : > { %s1718_s13 = smov %s1374_s14  ;;  %s1719_s14 = smov %s1446_s21 }
 0x1aa   : > { %s1720_s15 = smov %s1434_s18  ;;  %19 = sbr.rel (!%p17_p9) target bundleno = 6 (0x6), region = 81 }
 0x1af   :  { %878 = vsyncpa [#allocation3], 1 }
 0x1b0   :  { %880 = vsyncpa [#allocation3 + $0x1], 1 }
 0x1b1   :  { %881 = vsyncpa [#allocation6], 1 }
 0x1b2   :  { %882 = vsyncpa [#allocation4], 1 }
 0x1b3   :  { %884 = vsyncpa [#allocation4 + $0x1], 1 }

</bundles_post_ra>
